<compile_context>
chip_gen: v7x
topology: tpu7x:2x2x1
jax: 0.10.0
libtpu: 0.0.40
codegen_flags: <defaults>
</compile_context>

<pallas_src>
import functools

import jax
import jax.numpy as jnp
from jax import lax
from jax.experimental import pallas as pl
from jax.experimental.pallas import tpu as pltpu

_LANE_CHUNK = 512   # in-kernel sub-chunk width (multiple of 256 for v6e/v7x MXU)
_MAX_TB = 8192      # per-grid-step batch tile upper bound (sweepable; mult of 512)


def _pick_tb(batch):
    """Batch tile: as fat as reasonable, multiple of 512, >=2 steps at large B."""
    b_pad_min = pl.cdiv(batch, _LANE_CHUNK) * _LANE_CHUNK
    if b_pad_min <= _MAX_TB:
        return b_pad_min                         # one fat step covers everything
    steps = max(2, pl.cdiv(b_pad_min, _MAX_TB))  # keep both v7x TCs busy
    return pl.cdiv(pl.cdiv(b_pad_min, steps), _LANE_CHUNK) * _LANE_CHUNK


def mlp_kernel(x_ref, w1_ref, b1_ref, w2_ref, b2_ref,
               w3_ref, b3_ref, w4_ref, b4_ref, o_ref):
    # x_ref: [n, TB] bf16 (batch on the lane axis); o_ref: [1, TB] f32.
    # Weights/biases are small and VMEM-resident; load them once per step.
    w1 = w1_ref[...]; b1 = b1_ref[...]
    w2 = w2_ref[...]; b2 = b2_ref[...]
    w3 = w3_ref[...]; b3 = b3_ref[...]
    w4 = w4_ref[...]; b4 = b4_ref[...]

    tb = x_ref.shape[1]
    n_chunks = tb // _LANE_CHUNK                 # static (tb is a mult of 512)

    def body(c, carry):
        off = pl.multiple_of(c * _LANE_CHUNK, _LANE_CHUNK)
        xc = x_ref[:, pl.ds(off, _LANE_CHUNK)]                  # [n, CH] bf16
        # fc1 + ReLU   -> [64, CH]
        h = jnp.dot(w1, xc, preferred_element_type=jnp.float32)
        h = jnp.maximum(h + b1, 0.0)
        # fc12 + ReLU  -> [64, CH]
        h = jnp.dot(w2, h.astype(w2.dtype), preferred_element_type=jnp.float32)
        h = jnp.maximum(h + b2, 0.0)
        # fc2 + ReLU   -> [32, CH]
        h = jnp.dot(w3, h.astype(w3.dtype), preferred_element_type=jnp.float32)
        h = jnp.maximum(h + b3, 0.0)
        # fc3 + Sigmoid -> [1, CH]  (lane-dense store of this chunk)
        z = jnp.dot(w4, h.astype(w4.dtype), preferred_element_type=jnp.float32)
        z = z + b4
        e = jnp.exp(-z)                                          # EUP
        o_ref[:, pl.ds(off, _LANE_CHUNK)] = (1.0 / (1.0 + e)).astype(o_ref.dtype)
        return carry

    unroll = 2 if (n_chunks >= 2 and n_chunks % 2 == 0) else 1
    lax.fori_loop(0, n_chunks, body, 0, unroll=unroll)


@functools.partial(jax.jit, static_argnames=("tb",))
def simple_nn_forward(x, params, *, tb=None):
    """x: [B, n] float32. params: PyTorch-layout weights w_i [out, in], biases b_i [out]."""
    B, n = x.shape
    if tb is None:
        tb = _pick_tb(B)
    b_pad = pl.cdiv(B, tb) * tb

    # Layout plumbing (see module docstring): pad batch to a tile multiple,
    # transpose so batch rides the lane axis, cast matmul operand to bf16.
    x_t = jnp.pad(x, ((0, b_pad - B), (0, 0))).T.astype(jnp.bfloat16)   # [n, b_pad]

    w1 = params["w1"].astype(jnp.bfloat16)   # [64, n]
    w2 = params["w2"].astype(jnp.bfloat16)   # [64, 64]
    w3 = params["w3"].astype(jnp.bfloat16)   # [32, 64]
    w4 = params["w4"].astype(jnp.bfloat16)   # [1, 32]
    b1 = params["b1"].reshape(-1, 1)         # [64, 1] f32
    b2 = params["b2"].reshape(-1, 1)         # [64, 1]
    b3 = params["b3"].reshape(-1, 1)         # [32, 1]
    b4 = params["b4"].reshape(-1, 1)         # [1, 1]

    # Weights/biases: constant block index -> DMA'd once, VMEM-resident.
    resident = lambda a: pl.BlockSpec(a.shape, lambda i: (0, 0))

    flops = 2 * b_pad * (n * 64 + 64 * 64 + 64 * 32 + 32 * 1)
    bytes_accessed = (x_t.size * 2
                      + sum(w.size * 2 for w in (w1, w2, w3, w4))
                      + sum(b.size * 4 for b in (b1, b2, b3, b4))
                      + b_pad * 4)

    # Explicit VMEM budget: double-buffered input/output tiles + resident
    # weights + in-flight chunk intermediates + headroom, clamped to [16, 48] MiB
    # (v5e scoped default is only 16 MiB; v7x per-TC VMEM is 64 MiB physical).
    vmem_budget = (2 * (n * tb * 2)                      # input tile, bf16, x2 bufs
                   + 2 * (tb * 4)                        # output tile, f32, x2 bufs
                   + 2 * sum(w.size * 2 for w in (w1, w2, w3, w4))
                   + 2 * sum(b.size * 4 for b in (b1, b2, b3, b4))
                   + 4 * (64 + 64 + 32 + 1) * _LANE_CHUNK * 4   # chunk intermediates
                   + (4 << 20))                                  # headroom
    vmem_limit = int(min(48 << 20, max(16 << 20, vmem_budget)))

    out_t = pl.pallas_call(
        mlp_kernel,
        out_shape=jax.ShapeDtypeStruct((1, b_pad), jnp.float32),
        grid=(b_pad // tb,),
        in_specs=[
            pl.BlockSpec((n, tb), lambda i: (0, i)),     # batch tile of x^T
            resident(w1), resident(b1),
            resident(w2), resident(b2),
            resident(w3), resident(b3),
            resident(w4), resident(b4),
        ],
        out_specs=pl.BlockSpec((1, tb), lambda i: (0, i)),
        compiler_params=pltpu.CompilerParams(
            dimension_semantics=("parallel",),            # megacore-shardable on v7x
            vmem_limit_bytes=vmem_limit),
        cost_estimate=pl.CostEstimate(
            flops=flops, transcendentals=b_pad,
            bytes_accessed=bytes_accessed),
    )(x_t, w1, b1, w2, b2, w3, b3, w4, b4)

    return out_t[:, :B].T                                 # [B, 1]


def init_params(key, n_in):
    """Deterministic init mimicking PyTorch nn.Linear default (uniform +/- 1/sqrt(fan_in)).
    Weights are stored in PyTorch layout [out, in]."""
    dims = [(n_in, 64), (64, 64), (64, 32), (32, 1)]
    params = {}
    for idx, (fan_in, fan_out) in enumerate(dims, start=1):
        key, kw, kb = jax.random.split(key, 3)
        bound = 1.0 / jnp.sqrt(fan_in)
        params[f"w{idx}"] = jax.random.uniform(
            kw, (fan_out, fan_in), jnp.float32, -bound, bound)
        params[f"b{idx}"] = jax.random.uniform(
            kb, (fan_out,), jnp.float32, -bound, bound)
    return params


def reference_forward(x, params):
    """Pure-JAX f32 reference matching the PyTorch forward."""
    h = jnp.maximum(x @ params["w1"].T + params["b1"], 0.0)
    h = jnp.maximum(h @ params["w2"].T + params["b2"], 0.0)
    h = jnp.maximum(h @ params["w3"].T + params["b3"], 0.0)
    z = h @ params["w4"].T + params["b4"]
    return jax.nn.sigmoid(z)


if __name__ == "__main__":
    B, n = 8, 16  # small synthetic shapes: batch=8, n input features=16
    key = jax.random.PRNGKey(0)
    key, kx = jax.random.split(key)
    x = jax.random.normal(kx, (B, n), dtype=jnp.float32)
    params = init_params(key, n)

    out = jax.block_until_ready(simple_nn_forward(x, params))
    ref = reference_forward(x, params)

    assert out.shape == (B, 1)
    # bf16 matmul operands (f32 accumulate) => loose-ish tolerance vs f32 ref.
    err = float(jnp.max(jnp.abs(out - ref)))
    assert jnp.allclose(out, ref, atol=3e-2, rtol=0.0), f"max abs err {err}"

    print("KERNEL_OK")
</pallas_src>

<mosaic_0001>
module attributes {stable_mosaic.version = 11 : i64} {
  func.func @mlp_kernel(%arg0: i32, %arg1: memref<16x512xbf16, #tpu.memory_space<vmem>>, %arg2: memref<64x16xbf16, #tpu.memory_space<vmem>>, %arg3: memref<64x1xf32, #tpu.memory_space<vmem>>, %arg4: memref<64x64xbf16, #tpu.memory_space<vmem>>, %arg5: memref<64x1xf32, #tpu.memory_space<vmem>>, %arg6: memref<32x64xbf16, #tpu.memory_space<vmem>>, %arg7: memref<32x1xf32, #tpu.memory_space<vmem>>, %arg8: memref<1x32xbf16, #tpu.memory_space<vmem>>, %arg9: memref<1x1xf32, #tpu.memory_space<vmem>>, %arg10: memref<1x512xf32, #tpu.memory_space<vmem>>) attributes {dimension_semantics = [#tpu.dimension_semantics<parallel>], iteration_bounds = array<i64: 1>, scalar_prefetch = 0 : i64, scratch_operands = 0 : i64, tpu.core_type = #tpu.core_type<tc>, window_params = [{transform_indices = @transform_0, window_bounds = array<i64: 16, 512>}, {pipeline_mode = #tpu.pipeline_mode<synchronous>, transform_indices = @transform_1, window_bounds = array<i64: 64, 16>}, {pipeline_mode = #tpu.pipeline_mode<synchronous>, transform_indices = @transform_2, window_bounds = array<i64: 64, 1>}, {pipeline_mode = #tpu.pipeline_mode<synchronous>, transform_indices = @transform_3, window_bounds = array<i64: 64, 64>}, {pipeline_mode = #tpu.pipeline_mode<synchronous>, transform_indices = @transform_4, window_bounds = array<i64: 64, 1>}, {pipeline_mode = #tpu.pipeline_mode<synchronous>, transform_indices = @transform_5, window_bounds = array<i64: 32, 64>}, {pipeline_mode = #tpu.pipeline_mode<synchronous>, transform_indices = @transform_6, window_bounds = array<i64: 32, 1>}, {pipeline_mode = #tpu.pipeline_mode<synchronous>, transform_indices = @transform_7, window_bounds = array<i64: 1, 32>}, {pipeline_mode = #tpu.pipeline_mode<synchronous>, transform_indices = @transform_8, window_bounds = array<i64: 1, 1>}, {transform_indices = @transform_9, window_bounds = array<i64: 1, 512>}]} {
    %c0 = arith.constant 0 : index
    %c0_0 = arith.constant 0 : index
    %0 = vector.load %arg2[%c0, %c0_0] : memref<64x16xbf16, #tpu.memory_space<vmem>>, vector<64x16xbf16>
    %c0_1 = arith.constant 0 : index
    %c0_2 = arith.constant 0 : index
    %1 = vector.load %arg3[%c0_1, %c0_2] : memref<64x1xf32, #tpu.memory_space<vmem>>, vector<64x1xf32>
    %c0_3 = arith.constant 0 : index
    %c0_4 = arith.constant 0 : index
    %2 = vector.load %arg4[%c0_3, %c0_4] : memref<64x64xbf16, #tpu.memory_space<vmem>>, vector<64x64xbf16>
    %c0_5 = arith.constant 0 : index
    %c0_6 = arith.constant 0 : index
    %3 = vector.load %arg5[%c0_5, %c0_6] : memref<64x1xf32, #tpu.memory_space<vmem>>, vector<64x1xf32>
    %c0_7 = arith.constant 0 : index
    %c0_8 = arith.constant 0 : index
    %4 = vector.load %arg6[%c0_7, %c0_8] : memref<32x64xbf16, #tpu.memory_space<vmem>>, vector<32x64xbf16>
    %c0_9 = arith.constant 0 : index
    %c0_10 = arith.constant 0 : index
    %5 = vector.load %arg7[%c0_9, %c0_10] : memref<32x1xf32, #tpu.memory_space<vmem>>, vector<32x1xf32>
    %c0_11 = arith.constant 0 : index
    %c0_12 = arith.constant 0 : index
    %6 = vector.load %arg8[%c0_11, %c0_12] : memref<1x32xbf16, #tpu.memory_space<vmem>>, vector<1x32xbf16>
    %c0_13 = arith.constant 0 : index
    %c0_14 = arith.constant 0 : index
    %7 = vector.load %arg9[%c0_13, %c0_14] : memref<1x1xf32, #tpu.memory_space<vmem>>, vector<1x1xf32>
    %c0_i32 = arith.constant 0 : i32
    %c512_i32 = arith.constant 512 : i32
    %8 = arith.muli %c0_i32, %c512_i32 : i32
    %9 = tpu.assume_multiple %8, 512 : i32
    %c0_15 = arith.constant 0 : index
    %10 = arith.index_cast %9 : i32 to index
    %11 = vector.load %arg1[%c0_15, %10] : memref<16x512xbf16, #tpu.memory_space<vmem>>, vector<16x512xbf16>
    %cst = arith.constant dense<0.000000e+00> : vector<64x512xf32>
    %12 = tpu.matmul %0, %11, %cst {dimension_numbers = #tpu.dot_dimension_numbers<[1], [0], [0], [1], [0, 0, 1, 1], [], []>} : vector<64x16xbf16>, vector<16x512xbf16>, vector<64x512xf32> -> vector<64x512xf32>
    %13 = vector.broadcast %1 : vector<64x1xf32> to vector<64x512xf32>
    %14 = arith.addf %12, %13 : vector<64x512xf32>
    %cst_16 = arith.constant 0.000000e+00 : f32
    %15 = vector.broadcast %cst_16 : f32 to vector<64x512xf32>
    %16 = arith.maximumf %14, %15 : vector<64x512xf32>
    %17 = arith.truncf %16 : vector<64x512xf32> to vector<64x512xbf16>
    %cst_17 = arith.constant dense<0.000000e+00> : vector<64x512xf32>
    %18 = tpu.matmul %2, %17, %cst_17 {dimension_numbers = #tpu.dot_dimension_numbers<[1], [0], [0], [1], [0, 0, 1, 1], [], []>} : vector<64x64xbf16>, vector<64x512xbf16>, vector<64x512xf32> -> vector<64x512xf32>
    %19 = vector.broadcast %3 : vector<64x1xf32> to vector<64x512xf32>
    %20 = arith.addf %18, %19 : vector<64x512xf32>
    %cst_18 = arith.constant 0.000000e+00 : f32
    %21 = vector.broadcast %cst_18 : f32 to vector<64x512xf32>
    %22 = arith.maximumf %20, %21 : vector<64x512xf32>
    %23 = arith.truncf %22 : vector<64x512xf32> to vector<64x512xbf16>
    %cst_19 = arith.constant dense<0.000000e+00> : vector<32x512xf32>
    %24 = tpu.matmul %4, %23, %cst_19 {dimension_numbers = #tpu.dot_dimension_numbers<[1], [0], [0], [1], [0, 0, 1, 1], [], []>} : vector<32x64xbf16>, vector<64x512xbf16>, vector<32x512xf32> -> vector<32x512xf32>
    %25 = vector.broadcast %5 : vector<32x1xf32> to vector<32x512xf32>
    %26 = arith.addf %24, %25 : vector<32x512xf32>
    %cst_20 = arith.constant 0.000000e+00 : f32
    %27 = vector.broadcast %cst_20 : f32 to vector<32x512xf32>
    %28 = arith.maximumf %26, %27 : vector<32x512xf32>
    %29 = arith.truncf %28 : vector<32x512xf32> to vector<32x512xbf16>
    %cst_21 = arith.constant dense<0.000000e+00> : vector<1x512xf32>
    %30 = tpu.matmul %6, %29, %cst_21 {dimension_numbers = #tpu.dot_dimension_numbers<[1], [0], [0], [1], [0, 0, 1, 1], [], []>} : vector<1x32xbf16>, vector<32x512xbf16>, vector<1x512xf32> -> vector<1x512xf32>
    %31 = vector.broadcast %7 : vector<1x1xf32> to vector<1x512xf32>
    %32 = arith.addf %30, %31 : vector<1x512xf32>
    %cst_22 = arith.constant 0.000000e+00 : f32
    %33 = vector.broadcast %cst_22 : f32 to vector<1x512xf32>
    %34 = arith.subf %33, %32 : vector<1x512xf32>
    %35 = math.exp %34 : vector<1x512xf32>
    %cst_23 = arith.constant 1.000000e+00 : f32
    %36 = vector.broadcast %cst_23 : f32 to vector<1x512xf32>
    %37 = arith.addf %36, %35 : vector<1x512xf32>
    %cst_24 = arith.constant 1.000000e+00 : f32
    %38 = vector.broadcast %cst_24 : f32 to vector<1x512xf32>
    %39 = arith.divf %38, %37 : vector<1x512xf32>
    %c0_25 = arith.constant 0 : index
    %40 = arith.index_cast %9 : i32 to index
    %41 = vector.load %arg10[%c0_25, %40] : memref<1x512xf32, #tpu.memory_space<vmem>>, vector<1x512xf32>
    tpu.vector_store %arg10[%c0_25, %40], %39 {strides = array<i32>} : memref<1x512xf32, #tpu.memory_space<vmem>>, vector<1x512xf32>,
    %c1_i32 = arith.constant 1 : i32
    return
  }
  func.func @transform_0(%arg0: i32) -> (i32, i32) {
    %c0_i32 = arith.constant 0 : i32
    %c0_i32_0 = arith.constant 0 : i32
    return %c0_i32, %arg0 : i32, i32
  }
  func.func @transform_1(%arg0: i32) -> (i32, i32) {
    %c0_i32 = arith.constant 0 : i32
    %c0_i32_0 = arith.constant 0 : i32
    %c0_i32_1 = arith.constant 0 : i32
    return %c0_i32, %c0_i32_0 : i32, i32
  }
  func.func @transform_2(%arg0: i32) -> (i32, i32) {
    %c0_i32 = arith.constant 0 : i32
    %c0_i32_0 = arith.constant 0 : i32
    %c0_i32_1 = arith.constant 0 : i32
    return %c0_i32, %c0_i32_0 : i32, i32
  }
  func.func @transform_3(%arg0: i32) -> (i32, i32) {
    %c0_i32 = arith.constant 0 : i32
    %c0_i32_0 = arith.constant 0 : i32
    %c0_i32_1 = arith.constant 0 : i32
    return %c0_i32, %c0_i32_0 : i32, i32
  }
  func.func @transform_4(%arg0: i32) -> (i32, i32) {
    %c0_i32 = arith.constant 0 : i32
    %c0_i32_0 = arith.constant 0 : i32
    %c0_i32_1 = arith.constant 0 : i32
    return %c0_i32, %c0_i32_0 : i32, i32
  }
  func.func @transform_5(%arg0: i32) -> (i32, i32) {
    %c0_i32 = arith.constant 0 : i32
    %c0_i32_0 = arith.constant 0 : i32
    %c0_i32_1 = arith.constant 0 : i32
    return %c0_i32, %c0_i32_0 : i32, i32
  }
  func.func @transform_6(%arg0: i32) -> (i32, i32) {
    %c0_i32 = arith.constant 0 : i32
    %c0_i32_0 = arith.constant 0 : i32
    %c0_i32_1 = arith.constant 0 : i32
    return %c0_i32, %c0_i32_0 : i32, i32
  }
  func.func @transform_7(%arg0: i32) -> (i32, i32) {
    %c0_i32 = arith.constant 0 : i32
    %c0_i32_0 = arith.constant 0 : i32
    %c0_i32_1 = arith.constant 0 : i32
    return %c0_i32, %c0_i32_0 : i32, i32
  }
  func.func @transform_8(%arg0: i32) -> (i32, i32) {
    %c0_i32 = arith.constant 0 : i32
    %c0_i32_0 = arith.constant 0 : i32
    %c0_i32_1 = arith.constant 0 : i32
    return %c0_i32, %c0_i32_0 : i32, i32
  }
  func.func @transform_9(%arg0: i32) -> (i32, i32) {
    %c0_i32 = arith.constant 0 : i32
    %c0_i32_0 = arith.constant 0 : i32
    return %c0_i32, %arg0 : i32, i32
  }
}

</mosaic_0001>

<bundles_post_ra>
// kernel: simple_nn_forward.1
= control target key start
LH: loop header
LB: loop body
LE: loop exit
PB: predicated region body
PF: predicated region fallthrough
CT: control target
= control target key end

     0   :  { %v1030_v1 = vmov 0   ;;  %vm161_vm0 = vcmask 130048   ;;  %vm428_vm1 = vcmask 523264   ;;  %vm810_vm2 = vcmask 261120   ;;  %s1237_s0 = inlined_call_operand.vmem [shape: bf16[16,512], index: 0, kind: input, shape index: {}]   ;;  %s1238_s8 = inlined_call_operand.<no memory space> [shape: f32[1,1], index: 8, kind: input, shape index: {}]   ;;  %s1239_s1 = inlined_call_operand.vmem [shape: bf16[64,16], index: 1, kind: input, shape index: {}]   ;;  %s1240_s2 = inlined_call_operand.vmem [shape: f32[64,1], index: 2, kind: input, shape index: {}]   ;;  %s1241_s4 = inlined_call_operand.vmem [shape: f32[64,1], index: 4, kind: input, shape index: {}]   ;;  %s1242_s6 = inlined_call_operand.vmem [shape: f32[32,1], index: 6, kind: input, shape index: {}]   ;;  %s1243_s3 = inlined_call_operand.vmem [shape: bf16[64,64], index: 3, kind: input, shape index: {}]   ;;  %s1244_s5 = inlined_call_operand.vmem [shape: bf16[32,64], index: 5, kind: input, shape index: {}]   ;;  %s1245_s7 = inlined_call_operand.vmem [shape: bf16[1,32], index: 7, kind: input, shape index: {}]   ;;  %s1246_s9 = inlined_call_operand.vmem [shape: f32[1,512], index: 9, kind: output, shape index: {}]  }
   0x1   :  { %v998_v0 = vld [vmem:[%s1237_s0 + $0x4] ss:$16 sps:$4 sm:$0xff]   ;;  %206 = vmatprep.mubr.bf16.mxu0 %v1030_v1  ;;  %279 = vmatprep.mubr.bf16.mxu1 %v1030_v1  ;;  %v14_v2 = vstv %s1238_s8  ;;  %v1000_v3 = vld [vmem:[%s1237_s0 + $0xc] ss:$16 sps:$4 sm:$0xff]   ;;  %v1002_v4 = vld [vmem:[%s1237_s0] ss:$16 sps:$4 sm:$0xff]  }
   0x2   :  { %996 = vset.pattern.permute.xlu0 %v1030_v1  ;;  %997 = vset.pattern.permute.xlu1 %v1030_v1  ;;  %15 = vst [vmem:[#allocation2] sm:$0x1] %v14_v2  ;;  %v1003_v5 = vld [vmem:[%s1237_s0 + $0x8] ss:$16 sps:$4 sm:$0xff]   ;;  %v1004_v6 = vld [vmem:[%s1239_s1] sm:$0xff]   ;;  %v45_v8 = vld [vmem:[%s1240_s2 + $0x10] sm:$0xff] }
   0x3   :  { %174 = vmatprep.subr.bf16.mxu0 %v998_v0  ;;  %247 = vmatprep.subr.bf16.mxu1 %v1000_v3  ;;  %v43_v7 = vld [vmem:[%s1240_s2] sm:$0xff]  ;;  %v44_v9 = vld [vmem:[%s1240_s2 + $0x8] sm:$0xff]  ;;  %v46_v10 = vld [vmem:[%s1240_s2 + $0x18] sm:$0xff] }
   0x4   :  { %175 = vmatpush1.bf16.msra.mxu0 %v1002_v4  ;;  %248 = vmatpush1.bf16.msra.mxu1 %v1003_v5  ;;  %v1005_v11 = vld [vmem:[%s1239_s1 + $0x8] sm:$0xff]   ;;  %v47_v12 = vld [vmem:[%s1240_s2 + $0x20] sm:$0xff]  ;;  %v49_v14 = vld [vmem:[%s1240_s2 + $0x30] sm:$0xff] }
   0x5   :  { %83 = vperm.xlu0 %996, %v43_v7   ;;  %93 = vperm.xlu1 %997, %v45_v8   ;;  %v48_v13 = vld [vmem:[%s1240_s2 + $0x28] sm:$0xff]  ;;  %v50_v15 = vld [vmem:[%s1240_s2 + $0x38] sm:$0xff]  ;;  %v1006_v16 = vld [vmem:[%s1239_s1 + $0x10] sm:$0xff]  }
   0x6   :  { %v59_v17 = vld [vmem:[%s1241_s4] sm:$0xff]  ;;  %v60_v18 = vld [vmem:[%s1241_s4 + $0x8] sm:$0xff]  ;;  %v61_v19 = vld [vmem:[%s1241_s4 + $0x10] sm:$0xff] }
   0x7   :  { %966 = vmatmul.mubr.msk.bf16.vlgmr.msra.gmra.mrb[0].mxu0 %vm161_vm0, %v1004_v6  ;;  %970 = vmatmul.mubr.msk.bf16.vlgmr.msra.gmra.mrb[0].mxu1 %vm161_vm0, %v1004_v6  ;;  %v62_v20 = vld [vmem:[%s1241_s4 + $0x18] sm:$0xff]  ;;  %v63_v22 = vld [vmem:[%s1241_s4 + $0x20] sm:$0xff]  ;;  %v64_v23 = vld [vmem:[%s1241_s4 + $0x28] sm:$0xff] }
   0x8   :  { %216 = vmatprep.mubr.bf16.mxu0 %v1030_v1  ;;  %289 = vmatprep.mubr.bf16.mxu1 %v1030_v1  ;;  %v1007_v21 = vld [vmem:[%s1239_s1 + $0x18] sm:$0xff]   ;;  %v65_v24 = vld [vmem:[%s1241_s4 + $0x30] sm:$0xff]  ;;  %v71_v26 = vld [vmem:[%s1242_s6] sm:$0xff] }
   0x9   :  { %88 = vperm.xlu0 %996, %v44_v9   ;;  %98 = vperm.xlu1 %997, %v46_v10   ;;  %v66_v25 = vld [vmem:[%s1241_s4 + $0x38] sm:$0xff]  ;;  %v72_v27 = vld [vmem:[%s1242_s6 + $0x8] sm:$0xff]  ;;  %v73_v28 = vld [vmem:[%s1242_s6 + $0x10] sm:$0xff] }
   0xa   :  { %v74_v29 = vld [vmem:[%s1242_s6 + $0x18] sm:$0xff]  ;;  %v76_v30 = vld [vmem:[#allocation2] sm:$0x1] }
   0xd   :  { %103 = vperm.xlu0 %996, %v47_v12   ;;  %108 = vperm.xlu1 %997, %v48_v13  }
   0xf   :  { %967 = vmatmul.mubr.msk.bf16.gmra.mrb[4].mxu0 %vm161_vm0, %v1005_v11  ;;  %971 = vmatmul.mubr.msk.bf16.gmra.mrb[4].mxu1 %vm161_vm0, %v1005_v11 }
  0x10   :  { %226 = vmatprep.mubr.bf16.mxu0 %v1030_v1  ;;  %299 = vmatprep.mubr.bf16.mxu1 %v1030_v1 }
  0x11   :  { %113 = vperm.xlu0 %996, %v49_v14   ;;  %118 = vperm.xlu1 %997, %v50_v15  }
  0x15   :  { %370 = vperm.xlu0 %996, %v59_v17   ;;  %375 = vperm.xlu1 %997, %v60_v18  }
  0x17   :  { %968 = vmatmul.mubr.msk.bf16.gmra.mrb[8].mxu0 %vm161_vm0, %v1006_v16  ;;  %972 = vmatmul.mubr.msk.bf16.gmra.mrb[8].mxu1 %vm161_vm0, %v1006_v16 }
  0x18   :  { %236 = vmatprep.mubr.bf16.mxu0 %v1030_v1  ;;  %309 = vmatprep.mubr.bf16.mxu1 %v1030_v1 }
  0x19   :  { %380 = vperm.xlu0 %996, %v61_v19   ;;  %385 = vperm.xlu1 %997, %v62_v20  }
  0x1d   :  { %390 = vperm.xlu0 %996, %v63_v22   ;;  %395 = vperm.xlu1 %997, %v64_v23  }
  0x1f   :  { %969 = vmatmul.mubr.msk.bf16.gmra.mrb[12].mxu0 %vm161_vm0, %v1007_v21  ;;  %973 = vmatmul.mubr.msk.bf16.gmra.mrb[12].mxu1 %vm161_vm0, %v1007_v21 }
  0x20   :  { %473 = vmatprep.mubr.bf16.mxu0 %v1030_v1  ;;  %546 = vmatprep.mubr.bf16.mxu1 %v1030_v1 }
  0x21   :  { %400 = vperm.xlu0 %996, %v65_v24   ;;  %405 = vperm.xlu1 %997, %v66_v25  }
  0x25   :  { %637 = vperm.xlu0 %996, %v71_v26   ;;  %642 = vperm.xlu1 %997, %v72_v27  }
  0x29   :  { %647 = vperm.xlu0 %996, %v73_v28   ;;  %652 = vperm.xlu1 %997, %v74_v29  }
  0x2d   :  { %803 = vperm.xlu0 %996, %v76_v30  }
  0x84   :  { %v84_v31 = vpop.permute.xlu0 %83  ;;  %v94_v33 = vpop.permute.xlu1 %93 }
  0x88   :  { %v89_v32 = vpop.permute.xlu0 %88  ;;  %v99_v58 = vpop.permute.xlu1 %98 }
  0x8c   :  { %v104_v24 = vpop.permute.xlu0 %103  ;;  %v109_v25 = vpop.permute.xlu1 %108 }
  0xda   :  { %v208_v34 = vpop.f32.mrb[0].mxu0  ;;  %v281_v35 = vpop.f32.mrb[0].mxu1 }
  0xdb   :  { %v209_v36 = vadd.f32 %v208_v34, %v84_v31  ;;  %v282_v37 = vadd.f32 %v281_v35, %v84_v31  ;;  %v210_v38 = vpop.f32.mrb[1].mxu0  ;;  %v283_v39 = vpop.f32.mrb[1].mxu1 }
  0xdc   :  { %v211_v40 = vadd.f32 %v210_v38, %v84_v31  ;;  %v284_v41 = vadd.f32 %v283_v39, %v84_v31  ;;  %v212_v42 = vpop.f32.mrb[2].mxu0  ;;  %v285_v43 = vpop.f32.mrb[2].mxu1 }
  0xdd   :  { %v213_v44 = vadd.f32 %v212_v42, %v89_v32  ;;  %v286_v45 = vadd.f32 %v285_v43, %v89_v32  ;;  %v214_v46 = vpop.f32.mrb[3].mxu0  ;;  %v287_v47 = vpop.f32.mrb[3].mxu1  ;;  %v320_v50 = vmax.f32 %v209_v36, 0.0  ;;  %v322_v51 = vmax.f32 %v282_v37, 0.0 }
  0xde   :  { %v215_v48 = vadd.f32 %v214_v46, %v89_v32  ;;  %v288_v49 = vadd.f32 %v287_v47, %v89_v32  ;;  %v321_v54 = vmax.f32 %v211_v40, 0.0  ;;  %v323_v55 = vmax.f32 %v284_v41, 0.0 }
  0xdf   :  { %v324_v52 = vmax.f32 %v213_v44, 0.0  ;;  %v326_v53 = vmax.f32 %v286_v45, 0.0 }
  0xe0   :  { %v325_v56 = vmax.f32 %v215_v48, 0.0  ;;  %v327_v57 = vmax.f32 %v288_v49, 0.0 }
  0xe1   :  { %v352_v59 = vpack.c.bf16 %v324_v52, %v320_v50  ;;  %v354_v60 = vpack.c.bf16 %v326_v53, %v322_v51 }
  0xe2   :  { %v353_v61 = vpack.c.bf16 %v325_v56, %v321_v54  ;;  %v355_v62 = vpack.c.bf16 %v327_v57, %v323_v55  ;;  %v218_v63 = vpop.f32.mrb[4].mxu0  ;;  %v291_v0 = vpop.f32.mrb[4].mxu1 }
  0xe3   :  { %v219_v2 = vadd.f32 %v218_v63, %v94_v33  ;;  %v292_v3 = vadd.f32 %v291_v0, %v94_v33  ;;  %v220_v4 = vpop.f32.mrb[5].mxu0  ;;  %v293_v5 = vpop.f32.mrb[5].mxu1 }
  0xe4   :  { %v221_v6 = vadd.f32 %v220_v4, %v94_v33  ;;  %v294_v7 = vadd.f32 %v293_v5, %v94_v33  ;;  %v222_v8 = vpop.f32.mrb[6].mxu0  ;;  %v295_v9 = vpop.f32.mrb[6].mxu1  ;;  %441 = vmatprep.subr.bf16.mxu0 %v353_v61  ;;  %514 = vmatprep.subr.bf16.mxu1 %v355_v62 }
  0xe5   :  { %v223_v10 = vadd.f32 %v222_v8, %v99_v58  ;;  %v296_v11 = vadd.f32 %v295_v9, %v99_v58  ;;  %v224_v12 = vpop.f32.mrb[7].mxu0  ;;  %v297_v13 = vpop.f32.mrb[7].mxu1  ;;  %442 = vmatpush1.bf16.msra.mxu0 %v352_v59  ;;  %515 = vmatpush1.bf16.msra.mxu1 %v354_v60  ;;  %v328_v16 = vmax.f32 %v219_v2, 0.0  ;;  %v330_v17 = vmax.f32 %v292_v3, 0.0 }
  0xe6   :  { %v225_v14 = vadd.f32 %v224_v12, %v99_v58  ;;  %v298_v15 = vadd.f32 %v297_v13, %v99_v58  ;;  %v329_v20 = vmax.f32 %v221_v6, 0.0  ;;  %v331_v21 = vmax.f32 %v294_v7, 0.0  ;;  %v114_v54 = vpop.permute.xlu0 %113  ;;  %v119_v55 = vpop.permute.xlu1 %118 }
  0xe7   :  { %v332_v18 = vmax.f32 %v223_v10, 0.0  ;;  %v334_v19 = vmax.f32 %v296_v11, 0.0 }
  0xe8   :  { %v333_v22 = vmax.f32 %v225_v14, 0.0  ;;  %v335_v23 = vmax.f32 %v298_v15, 0.0 }
  0xe9   :  { %v356_v26 = vpack.c.bf16 %v332_v18, %v328_v16  ;;  %v358_v27 = vpack.c.bf16 %v334_v19, %v330_v17 }
  0xea   :  { %v357_v28 = vpack.c.bf16 %v333_v22, %v329_v20  ;;  %v359_v29 = vpack.c.bf16 %v335_v23, %v331_v21  ;;  %v228_v30 = vpop.f32.mrb[8].mxu0  ;;  %v301_v31 = vpop.f32.mrb[8].mxu1 }
  0xeb   :  { %v229_v32 = vadd.f32 %v228_v30, %v104_v24  ;;  %v302_v33 = vadd.f32 %v301_v31, %v104_v24  ;;  %v230_v34 = vpop.f32.mrb[9].mxu0  ;;  %v303_v35 = vpop.f32.mrb[9].mxu1 }
  0xec   :  { %v231_v36 = vadd.f32 %v230_v34, %v104_v24  ;;  %v304_v37 = vadd.f32 %v303_v35, %v104_v24  ;;  %v232_v38 = vpop.f32.mrb[10].mxu0  ;;  %v305_v39 = vpop.f32.mrb[10].mxu1  ;;  %443 = vmatprep.subr.bf16.mxu0 %v357_v28  ;;  %516 = vmatprep.subr.bf16.mxu1 %v359_v29  ;;  %v1011_v28 = vld [vmem:[%s1243_s3 + $0x18] sm:$0xff]  }
  0xed   :  { %v233_v40 = vadd.f32 %v232_v38, %v109_v25  ;;  %v306_v41 = vadd.f32 %v305_v39, %v109_v25  ;;  %v234_v42 = vpop.f32.mrb[11].mxu0  ;;  %v307_v43 = vpop.f32.mrb[11].mxu1  ;;  %444 = vmatpush1.bf16.msra.mxu0 %v356_v26  ;;  %517 = vmatpush1.bf16.msra.mxu1 %v358_v27  ;;  %v336_v46 = vmax.f32 %v229_v32, 0.0  ;;  %v338_v47 = vmax.f32 %v302_v33, 0.0  ;;  %v1009_v26 = vld [vmem:[%s1243_s3 + $0x8] sm:$0xff]   ;;  %v1010_v27 = vld [vmem:[%s1243_s3 + $0x10] sm:$0xff]  }
  0xee   :  { %v235_v44 = vadd.f32 %v234_v42, %v109_v25  ;;  %v308_v45 = vadd.f32 %v307_v43, %v109_v25  ;;  %v337_v50 = vmax.f32 %v231_v36, 0.0  ;;  %v339_v51 = vmax.f32 %v304_v37, 0.0  ;;  %v1008_v25 = vld [vmem:[%s1243_s3] sm:$0xff]   ;;  %v371_v29 = vpop.permute.xlu0 %370  ;;  %v376_v30 = vpop.permute.xlu1 %375 }
  0xef   :  { %v340_v48 = vmax.f32 %v233_v40, 0.0  ;;  %v342_v49 = vmax.f32 %v306_v41, 0.0 }
  0xf0   :  { %v341_v52 = vmax.f32 %v235_v44, 0.0  ;;  %v343_v53 = vmax.f32 %v308_v45, 0.0 }
  0xf1   :  { %v360_v56 = vpack.c.bf16 %v340_v48, %v336_v46  ;;  %v362_v57 = vpack.c.bf16 %v342_v49, %v338_v47 }
  0xf2   :  { %v361_v58 = vpack.c.bf16 %v341_v52, %v337_v50  ;;  %v363_v59 = vpack.c.bf16 %v343_v53, %v339_v51  ;;  %v238_v60 = vpop.f32.mrb[12].mxu0  ;;  %v311_v61 = vpop.f32.mrb[12].mxu1 }
  0xf3   :  { %v239_v62 = vadd.f32 %v238_v60, %v114_v54  ;;  %v312_v63 = vadd.f32 %v311_v61, %v114_v54  ;;  %v240_v0 = vpop.f32.mrb[13].mxu0  ;;  %v313_v2 = vpop.f32.mrb[13].mxu1 }
  0xf4   :  { %v241_v3 = vadd.f32 %v240_v0, %v114_v54  ;;  %v314_v4 = vadd.f32 %v313_v2, %v114_v54  ;;  %v242_v5 = vpop.f32.mrb[14].mxu0  ;;  %v315_v6 = vpop.f32.mrb[14].mxu1  ;;  %445 = vmatprep.subr.bf16.mxu0 %v361_v58  ;;  %518 = vmatprep.subr.bf16.mxu1 %v363_v59 }
  0xf5   :  { %v243_v7 = vadd.f32 %v242_v5, %v119_v55  ;;  %v316_v8 = vadd.f32 %v315_v6, %v119_v55  ;;  %v244_v9 = vpop.f32.mrb[15].mxu0  ;;  %v317_v10 = vpop.f32.mrb[15].mxu1  ;;  %446 = vmatpush1.bf16.msra.mxu0 %v360_v56  ;;  %519 = vmatpush1.bf16.msra.mxu1 %v362_v57  ;;  %v344_v13 = vmax.f32 %v239_v62, 0.0  ;;  %v346_v14 = vmax.f32 %v312_v63, 0.0 }
  0xf6   :  { %v245_v11 = vadd.f32 %v244_v9, %v119_v55  ;;  %v318_v12 = vadd.f32 %v317_v10, %v119_v55  ;;  %v345_v17 = vmax.f32 %v241_v3, 0.0  ;;  %v347_v18 = vmax.f32 %v314_v4, 0.0  ;;  %v381_v55 = vpop.permute.xlu0 %380  ;;  %v386_v56 = vpop.permute.xlu1 %385 }
  0xf7   :  { %v348_v15 = vmax.f32 %v243_v7, 0.0  ;;  %v350_v16 = vmax.f32 %v316_v8, 0.0 }
  0xf8   :  { %v349_v19 = vmax.f32 %v245_v11, 0.0  ;;  %v351_v20 = vmax.f32 %v318_v12, 0.0 }
  0xf9   :  { %v364_v21 = vpack.c.bf16 %v348_v15, %v344_v13  ;;  %v366_v22 = vpack.c.bf16 %v350_v16, %v346_v14 }
  0xfa   :  { %v365_v23 = vpack.c.bf16 %v349_v19, %v345_v17  ;;  %v367_v24 = vpack.c.bf16 %v351_v20, %v347_v18 }
  0xfc   :  { %447 = vmatprep.subr.bf16.mxu0 %v365_v23  ;;  %520 = vmatprep.subr.bf16.mxu1 %v367_v24  ;;  %v396_v23 = vpop.permute.xlu1 %395 }
  0xfd   :  { %448 = vmatpush1.bf16.msra.mxu0 %v364_v21  ;;  %521 = vmatpush1.bf16.msra.mxu1 %v366_v22  ;;  %v391_v22 = vpop.permute.xlu0 %390 }
 0x100   :  { %978 = vmatmul.mubr.msk.bf16.vlgmr.msra.gmra.mrb[16].mxu0 %vm428_vm1, %v1008_v25  ;;  %982 = vmatmul.mubr.msk.bf16.vlgmr.msra.gmra.mrb[16].mxu1 %vm428_vm1, %v1008_v25 }
 0x101   :  { %483 = vmatprep.mubr.bf16.mxu0 %v1030_v1  ;;  %556 = vmatprep.mubr.bf16.mxu1 %v1030_v1 }
 0x108   :  { %979 = vmatmul.mubr.msk.bf16.gmra.mrb[20].mxu0 %vm428_vm1, %v1009_v26  ;;  %983 = vmatmul.mubr.msk.bf16.gmra.mrb[20].mxu1 %vm428_vm1, %v1009_v26 }
 0x109   :  { %493 = vmatprep.mubr.bf16.mxu0 %v1030_v1  ;;  %566 = vmatprep.mubr.bf16.mxu1 %v1030_v1 }
 0x110   :  { %980 = vmatmul.mubr.msk.bf16.gmra.mrb[24].mxu0 %vm428_vm1, %v1010_v27  ;;  %984 = vmatmul.mubr.msk.bf16.gmra.mrb[24].mxu1 %vm428_vm1, %v1010_v27 }
 0x111   :  { %503 = vmatprep.mubr.bf16.mxu0 %v1030_v1  ;;  %576 = vmatprep.mubr.bf16.mxu1 %v1030_v1 }
 0x118   :  { %981 = vmatmul.mubr.msk.bf16.gmra.mrb[28].mxu0 %vm428_vm1, %v1011_v28  ;;  %985 = vmatmul.mubr.msk.bf16.gmra.mrb[28].mxu1 %vm428_vm1, %v1011_v28 }
 0x119   :  { %703 = vmatprep.mubr.bf16.mxu0 %v1030_v1  ;;  %756 = vmatprep.mubr.bf16.mxu1 %v1030_v1 }
 0x1d3   :  { %v475_v31 = vpop.f32.mrb[16].mxu0  ;;  %v548_v32 = vpop.f32.mrb[16].mxu1 }
 0x1d4   :  { %v476_v33 = vadd.f32 %v475_v31, %v371_v29  ;;  %v549_v34 = vadd.f32 %v548_v32, %v371_v29  ;;  %v477_v35 = vpop.f32.mrb[17].mxu0  ;;  %v550_v36 = vpop.f32.mrb[17].mxu1 }
 0x1d5   :  { %v478_v37 = vadd.f32 %v477_v35, %v371_v29  ;;  %v551_v38 = vadd.f32 %v550_v36, %v371_v29  ;;  %v479_v39 = vpop.f32.mrb[18].mxu0  ;;  %v552_v40 = vpop.f32.mrb[18].mxu1 }
 0x1d6   :  { %v480_v41 = vadd.f32 %v479_v39, %v376_v30  ;;  %v553_v42 = vadd.f32 %v552_v40, %v376_v30  ;;  %v481_v43 = vpop.f32.mrb[19].mxu0  ;;  %v554_v44 = vpop.f32.mrb[19].mxu1  ;;  %v587_v47 = vmax.f32 %v476_v33, 0.0  ;;  %v589_v48 = vmax.f32 %v549_v34, 0.0 }
 0x1d7   :  { %v482_v45 = vadd.f32 %v481_v43, %v376_v30  ;;  %v555_v46 = vadd.f32 %v554_v44, %v376_v30  ;;  %v588_v51 = vmax.f32 %v478_v37, 0.0  ;;  %v590_v52 = vmax.f32 %v551_v38, 0.0 }
 0x1d8   :  { %v591_v49 = vmax.f32 %v480_v41, 0.0  ;;  %v593_v50 = vmax.f32 %v553_v42, 0.0 }
 0x1d9   :  { %v592_v53 = vmax.f32 %v482_v45, 0.0  ;;  %v594_v54 = vmax.f32 %v555_v46, 0.0 }
 0x1da   :  { %v619_v57 = vpack.c.bf16 %v591_v49, %v587_v47  ;;  %v621_v58 = vpack.c.bf16 %v593_v50, %v589_v48 }
 0x1db   :  { %v620_v59 = vpack.c.bf16 %v592_v53, %v588_v51  ;;  %v622_v60 = vpack.c.bf16 %v594_v54, %v590_v52  ;;  %v485_v61 = vpop.f32.mrb[20].mxu0  ;;  %v558_v62 = vpop.f32.mrb[20].mxu1 }
 0x1dc   :  { %v486_v63 = vadd.f32 %v485_v61, %v381_v55  ;;  %v559_v0 = vadd.f32 %v558_v62, %v381_v55  ;;  %v487_v2 = vpop.f32.mrb[21].mxu0  ;;  %v560_v3 = vpop.f32.mrb[21].mxu1 }
 0x1dd   :  { %v488_v4 = vadd.f32 %v487_v2, %v381_v55  ;;  %v561_v5 = vadd.f32 %v560_v3, %v381_v55  ;;  %v489_v6 = vpop.f32.mrb[22].mxu0  ;;  %v562_v7 = vpop.f32.mrb[22].mxu1  ;;  %671 = vmatprep.subr.bf16.mxu0 %v620_v59  ;;  %724 = vmatprep.subr.bf16.mxu1 %v622_v60 }
 0x1de   :  { %v490_v8 = vadd.f32 %v489_v6, %v386_v56  ;;  %v563_v9 = vadd.f32 %v562_v7, %v386_v56  ;;  %v491_v10 = vpop.f32.mrb[23].mxu0  ;;  %v564_v11 = vpop.f32.mrb[23].mxu1  ;;  %672 = vmatpush1.bf16.msra.mxu0 %v619_v57  ;;  %725 = vmatpush1.bf16.msra.mxu1 %v621_v58  ;;  %v595_v14 = vmax.f32 %v486_v63, 0.0  ;;  %v597_v15 = vmax.f32 %v559_v0, 0.0 }
 0x1df   :  { %v492_v12 = vadd.f32 %v491_v10, %v386_v56  ;;  %v565_v13 = vadd.f32 %v564_v11, %v386_v56  ;;  %v596_v18 = vmax.f32 %v488_v4, 0.0  ;;  %v598_v19 = vmax.f32 %v561_v5, 0.0  ;;  %v401_v52 = vpop.permute.xlu0 %400  ;;  %v406_v53 = vpop.permute.xlu1 %405 }
 0x1e0   :  { %v599_v16 = vmax.f32 %v490_v8, 0.0  ;;  %v601_v17 = vmax.f32 %v563_v9, 0.0 }
 0x1e1   :  { %v600_v20 = vmax.f32 %v492_v12, 0.0  ;;  %v602_v21 = vmax.f32 %v565_v13, 0.0 }
 0x1e2   :  { %v623_v24 = vpack.c.bf16 %v599_v16, %v595_v14  ;;  %v625_v25 = vpack.c.bf16 %v601_v17, %v597_v15 }
 0x1e3   :  { %v624_v26 = vpack.c.bf16 %v600_v20, %v596_v18  ;;  %v626_v27 = vpack.c.bf16 %v602_v21, %v598_v19  ;;  %v495_v28 = vpop.f32.mrb[24].mxu0  ;;  %v568_v29 = vpop.f32.mrb[24].mxu1 }
 0x1e4   :  { %v496_v30 = vadd.f32 %v495_v28, %v391_v22  ;;  %v569_v31 = vadd.f32 %v568_v29, %v391_v22  ;;  %v497_v32 = vpop.f32.mrb[25].mxu0  ;;  %v570_v33 = vpop.f32.mrb[25].mxu1 }
 0x1e5   :  { %v498_v34 = vadd.f32 %v497_v32, %v391_v22  ;;  %v571_v35 = vadd.f32 %v570_v33, %v391_v22  ;;  %v499_v36 = vpop.f32.mrb[26].mxu0  ;;  %v572_v37 = vpop.f32.mrb[26].mxu1  ;;  %673 = vmatprep.subr.bf16.mxu0 %v624_v26  ;;  %726 = vmatprep.subr.bf16.mxu1 %v626_v27 }
 0x1e6   :  { %v500_v38 = vadd.f32 %v499_v36, %v396_v23  ;;  %v573_v39 = vadd.f32 %v572_v37, %v396_v23  ;;  %v501_v40 = vpop.f32.mrb[27].mxu0  ;;  %v574_v41 = vpop.f32.mrb[27].mxu1  ;;  %674 = vmatpush1.bf16.msra.mxu0 %v623_v24  ;;  %727 = vmatpush1.bf16.msra.mxu1 %v625_v25  ;;  %v603_v44 = vmax.f32 %v496_v30, 0.0  ;;  %v605_v45 = vmax.f32 %v569_v31, 0.0  ;;  %v1013_v24 = vld [vmem:[%s1244_s5 + $0x8] sm:$0xff]  }
 0x1e7   :  { %v502_v42 = vadd.f32 %v501_v40, %v396_v23  ;;  %v575_v43 = vadd.f32 %v574_v41, %v396_v23  ;;  %v604_v48 = vmax.f32 %v498_v34, 0.0  ;;  %v606_v49 = vmax.f32 %v571_v35, 0.0  ;;  %v1012_v23 = vld [vmem:[%s1244_s5] sm:$0xff]   ;;  %v638_v25 = vpop.permute.xlu0 %637  ;;  %v643_v26 = vpop.permute.xlu1 %642 }
 0x1e8   :  { %v607_v46 = vmax.f32 %v500_v38, 0.0  ;;  %v609_v47 = vmax.f32 %v573_v39, 0.0 }
 0x1e9   :  { %v608_v50 = vmax.f32 %v502_v42, 0.0  ;;  %v610_v51 = vmax.f32 %v575_v43, 0.0 }
 0x1ea   :  { %v627_v54 = vpack.c.bf16 %v607_v46, %v603_v44  ;;  %v629_v55 = vpack.c.bf16 %v609_v47, %v605_v45 }
 0x1eb   :  { %v628_v56 = vpack.c.bf16 %v608_v50, %v604_v48  ;;  %v630_v57 = vpack.c.bf16 %v610_v51, %v606_v49  ;;  %v505_v58 = vpop.f32.mrb[28].mxu0  ;;  %v578_v59 = vpop.f32.mrb[28].mxu1 }
 0x1ec   :  { %v506_v60 = vadd.f32 %v505_v58, %v401_v52  ;;  %v579_v61 = vadd.f32 %v578_v59, %v401_v52  ;;  %v507_v62 = vpop.f32.mrb[29].mxu0  ;;  %v580_v63 = vpop.f32.mrb[29].mxu1 }
 0x1ed   :  { %v508_v0 = vadd.f32 %v507_v62, %v401_v52  ;;  %v581_v2 = vadd.f32 %v580_v63, %v401_v52  ;;  %v509_v3 = vpop.f32.mrb[30].mxu0  ;;  %v582_v4 = vpop.f32.mrb[30].mxu1  ;;  %675 = vmatprep.subr.bf16.mxu0 %v628_v56  ;;  %728 = vmatprep.subr.bf16.mxu1 %v630_v57 }
 0x1ee   :  { %v510_v5 = vadd.f32 %v509_v3, %v406_v53  ;;  %v583_v6 = vadd.f32 %v582_v4, %v406_v53  ;;  %v511_v7 = vpop.f32.mrb[31].mxu0  ;;  %v584_v8 = vpop.f32.mrb[31].mxu1  ;;  %676 = vmatpush1.bf16.msra.mxu0 %v627_v54  ;;  %729 = vmatpush1.bf16.msra.mxu1 %v629_v55  ;;  %v611_v11 = vmax.f32 %v506_v60, 0.0  ;;  %v613_v12 = vmax.f32 %v579_v61, 0.0 }
 0x1ef   :  { %v512_v9 = vadd.f32 %v511_v7, %v406_v53  ;;  %v585_v10 = vadd.f32 %v584_v8, %v406_v53  ;;  %v612_v15 = vmax.f32 %v508_v0, 0.0  ;;  %v614_v16 = vmax.f32 %v581_v2, 0.0  ;;  %v648_v50 = vpop.permute.xlu0 %647  ;;  %v653_v51 = vpop.permute.xlu1 %652 }
 0x1f0   :  { %v615_v13 = vmax.f32 %v510_v5, 0.0  ;;  %v617_v14 = vmax.f32 %v583_v6, 0.0 }
 0x1f1   :  { %v616_v17 = vmax.f32 %v512_v9, 0.0  ;;  %v618_v18 = vmax.f32 %v585_v10, 0.0 }
 0x1f2   :  { %v631_v19 = vpack.c.bf16 %v615_v13, %v611_v11  ;;  %v633_v20 = vpack.c.bf16 %v617_v14, %v613_v12 }
 0x1f3   :  { %v632_v21 = vpack.c.bf16 %v616_v17, %v612_v15  ;;  %v634_v22 = vpack.c.bf16 %v618_v18, %v614_v16 }
 0x1f5   :  { %677 = vmatprep.subr.bf16.mxu0 %v632_v21  ;;  %730 = vmatprep.subr.bf16.mxu1 %v634_v22  ;;  %v75_v21 = vld [vmem:[%s1245_s7] sm:$0x1]  ;;  %v806_v22 = vlaneseq }
 0x1f6   :  { %678 = vmatpush1.bf16.msra.mxu0 %v631_v19  ;;  %731 = vmatpush1.bf16.msra.mxu1 %v633_v20 }
 0x1f7   :  { %vm951_vm3 = vcmp.lt.s32.totalorder %v806_v22, 512 }
 0x1f9   :  { %988 = vmatmul.mubr.msk.bf16.vlgmr.msra.gmra.mrb[32].mxu0 %vm428_vm1, %v1012_v23  ;;  %990 = vmatmul.mubr.msk.bf16.vlgmr.msra.gmra.mrb[32].mxu1 %vm428_vm1, %v1012_v23  ;;  %v807_v23 = vshrl.u32 %v806_v22, 7 }
 0x1fa   :  { %713 = vmatprep.mubr.bf16.mxu0 %v1030_v1  ;;  %766 = vmatprep.mubr.bf16.mxu1 %v1030_v1 }
 0x201   :  { %989 = vmatmul.mubr.msk.bf16.gmra.mrb[36].mxu0 %vm428_vm1, %v1013_v24  ;;  %991 = vmatmul.mubr.msk.bf16.gmra.mrb[36].mxu1 %vm428_vm1, %v1013_v24  ;;  %v808_v24 = vsub.s32 0, %v807_v23 }
 0x202   :  { %846 = vmatprep.mubr.bf16.mxu0 %v1030_v1  ;;  %887 = vmatprep.mubr.bf16.mxu1 %v1030_v1 }
 0x2cc   :  { %v705_v27 = vpop.f32.mrb[32].mxu0  ;;  %v758_v28 = vpop.f32.mrb[32].mxu1 }
 0x2cd   :  { %v706_v29 = vadd.f32 %v705_v27, %v638_v25  ;;  %v759_v30 = vadd.f32 %v758_v28, %v638_v25  ;;  %v707_v31 = vpop.f32.mrb[33].mxu0  ;;  %v760_v32 = vpop.f32.mrb[33].mxu1 }
 0x2ce   :  { %v708_v33 = vadd.f32 %v707_v31, %v638_v25  ;;  %v761_v34 = vadd.f32 %v760_v32, %v638_v25  ;;  %v709_v35 = vpop.f32.mrb[34].mxu0  ;;  %v762_v36 = vpop.f32.mrb[34].mxu1 }
 0x2cf   :  { %v710_v37 = vadd.f32 %v709_v35, %v643_v26  ;;  %v763_v38 = vadd.f32 %v762_v36, %v643_v26  ;;  %v711_v39 = vpop.f32.mrb[35].mxu0  ;;  %v764_v40 = vpop.f32.mrb[35].mxu1  ;;  %v777_v43 = vmax.f32 %v706_v29, 0.0  ;;  %v779_v1 = vmax.f32 %v759_v30, 0.0 }
 0x2d0   :  { %v712_v41 = vadd.f32 %v711_v39, %v643_v26  ;;  %v765_v42 = vadd.f32 %v764_v40, %v643_v26  ;;  %v778_v46 = vmax.f32 %v708_v33, 0.0  ;;  %v780_v47 = vmax.f32 %v761_v34, 0.0  ;;  %v804_v25 = vpop.permute.xlu0 %803 }
 0x2d1   :  { %v781_v44 = vmax.f32 %v710_v37, 0.0  ;;  %v783_v45 = vmax.f32 %v763_v38, 0.0  ;;  %v809_v26 = vrot.slane %v804_v25, %v808_v24 }
 0x2d2   :  { %v782_v48 = vmax.f32 %v712_v41, 0.0  ;;  %v784_v49 = vmax.f32 %v765_v42, 0.0 }
 0x2d3   :  { %v793_v52 = vpack.c.bf16 %v781_v44, %v777_v43  ;;  %v795_v53 = vpack.c.bf16 %v783_v45, %v779_v1 }
 0x2d4   :  { %v794_v54 = vpack.c.bf16 %v782_v48, %v778_v46  ;;  %v796_v55 = vpack.c.bf16 %v784_v49, %v780_v47  ;;  %v715_v56 = vpop.f32.mrb[36].mxu0  ;;  %v768_v57 = vpop.f32.mrb[36].mxu1 }
 0x2d5   :  { %v716_v58 = vadd.f32 %v715_v56, %v648_v50  ;;  %v769_v59 = vadd.f32 %v768_v57, %v648_v50  ;;  %v717_v60 = vpop.f32.mrb[37].mxu0  ;;  %v770_v61 = vpop.f32.mrb[37].mxu1 }
 0x2d6   :  { %v718_v62 = vadd.f32 %v717_v60, %v648_v50  ;;  %v771_v63 = vadd.f32 %v770_v61, %v648_v50  ;;  %v719_v0 = vpop.f32.mrb[38].mxu0  ;;  %v772_v2 = vpop.f32.mrb[38].mxu1  ;;  %814 = vmatprep.subr.bf16.mxu0 %v794_v54  ;;  %855 = vmatprep.subr.bf16.mxu1 %v796_v55  ;;  %v1031_v54 = vmov 1966171168  }
 0x2d7   :  { %v720_v3 = vadd.f32 %v719_v0, %v653_v51  ;;  %v773_v4 = vadd.f32 %v772_v2, %v653_v51  ;;  %v721_v5 = vpop.f32.mrb[39].mxu0  ;;  %v774_v6 = vpop.f32.mrb[39].mxu1  ;;  %815 = vmatpush1.bf16.msra.mxu0 %v793_v52  ;;  %856 = vmatpush1.bf16.msra.mxu1 %v795_v53  ;;  %v785_v9 = vmax.f32 %v716_v58, 0.0  ;;  %v787_v10 = vmax.f32 %v769_v59, 0.0 }
 0x2d8   :  { %v722_v7 = vadd.f32 %v721_v5, %v653_v51  ;;  %v775_v8 = vadd.f32 %v774_v6, %v653_v51  ;;  %v786_v13 = vmax.f32 %v718_v62, 0.0  ;;  %v788_v14 = vmax.f32 %v771_v63, 0.0 }
 0x2d9   :  { %v789_v11 = vmax.f32 %v720_v3, 0.0  ;;  %v791_v12 = vmax.f32 %v773_v4, 0.0  ;;  %v927_v55 = vunpack.c.l.s4 %v1031_v54 }
 0x2da   :  { %v790_v15 = vmax.f32 %v722_v7, 0.0  ;;  %v792_v16 = vmax.f32 %v775_v8, 0.0 }
 0x2db   :  { %v797_v17 = vpack.c.bf16 %v789_v11, %v785_v9  ;;  %v799_v18 = vpack.c.bf16 %v791_v12, %v787_v10  ;;  %v928_v56 = vunpack.c.0.s8 %v927_v55 }
 0x2dc   :  { %v798_v19 = vpack.c.bf16 %v790_v15, %v786_v13  ;;  %v800_v20 = vpack.c.bf16 %v792_v16, %v788_v14 }
 0x2dd   :  { %v931_v59 = vsub.s32 %v928_v56, %v807_v23 }
 0x2de   :  { %816 = vmatprep.subr.bf16.mxu0 %v798_v19  ;;  %857 = vmatprep.subr.bf16.mxu1 %v800_v20 }
 0x2df   :  { %817 = vmatpush1.bf16.msra.mxu0 %v797_v17  ;;  %858 = vmatpush1.bf16.msra.mxu1 %v799_v18 }
 0x2e2   :  { %992 = vmatmul.mubr.msk.bf16.vlgmr.msra.gmra.mrb[40].mxu0 %vm810_vm2, %v75_v21  ;;  %993 = vmatmul.mubr.msk.bf16.vlgmr.msra.gmra.mrb[40].mxu1 %vm810_vm2, %v75_v21 }
 0x3b5   :  { %v848_v27 = vpop.f32.mrb[40].mxu0  ;;  %v889_v28 = vpop.f32.mrb[40].mxu1 }
 0x3b6   :  { %v849_v29 = vadd.f32 %v848_v27, %v809_v26  ;;  %v890_v30 = vadd.f32 %v889_v28, %v809_v26  ;;  %v850_v31 = vpop.f32.mrb[41].mxu0  ;;  %v891_v32 = vpop.f32.mrb[41].mxu1 }
 0x3b7   :  { %v851_v33 = vadd.f32 %v850_v31, %v809_v26  ;;  %v892_v34 = vadd.f32 %v891_v32, %v809_v26  ;;  %v852_v35 = vpop.f32.mrb[42].mxu0  ;;  %v893_v36 = vpop.f32.mrb[42].mxu1 }
 0x3b8   :  { %v896_v37 = vsub.f32 0.0, %v849_v29  ;;  %v898_v38 = vsub.f32 0.0, %v890_v30  ;;  %v853_v39 = vpop.f32.mrb[43].mxu0  ;;  %v894_v40 = vpop.f32.mrb[43].mxu1 }
 0x3b9   :  { %v897_v41 = vsub.f32 0.0, %v851_v33  ;;  %v899_v42 = vsub.f32 0.0, %v892_v34 }
 0x3ba   :  { %v900_v43 = vmul.f32 1.442695, %v896_v37  ;;  %v904_v1 = vmul.f32 1.442695, %v898_v38 }
 0x3bb   :  { %v902_v44 = vmul.f32 1.442695, %v897_v41  ;;  %v906_v45 = vmul.f32 1.442695, %v899_v42 }
 0x3bc   :  { %1014 = vpow2.f32 %v900_v43 }
 0x3bd   :  { %1016 = vpow2.f32 %v904_v1 }
 0x3be   :  { %1018 = vpow2.f32 %v902_v44 }
 0x3bf   :  { %1020 = vpow2.f32 %v906_v45 }
 0x3c6   :  { %v1015_v46 = vpop.eup %1014 }
 0x3c7   :  { %v1017_v47 = vpop.eup %1016  ;;  %v908_v48 = vadd.f32 1.0, %v1015_v46 }
 0x3c8   :  { %v1019_v49 = vpop.eup %1018  ;;  %v910_v50 = vadd.f32 1.0, %v1017_v47 }
 0x3c9   :  { %v1021_v51 = vpop.eup %1020  ;;  %1022 = vrcp.f32 %v908_v48  ;;  %v909_v52 = vadd.f32 1.0, %v1019_v49 }
 0x3ca   :  { %1024 = vrcp.f32 %v910_v50  ;;  %v911_v53 = vadd.f32 1.0, %v1021_v51 }
 0x3cb   :  { %1026 = vrcp.f32 %v909_v52 }
 0x3cc   :  { %1028 = vrcp.f32 %v911_v53 }
 0x3d3   :  { %v1023_v57 = vpop.eup %1022 }
 0x3d4   :  { %v1025_v58 = vpop.eup %1024 }
 0x3d5   :  { %v1027_v60 = vpop.eup %1026 }
 0x3d6   :  { %v1029_v61 = vpop.eup %1028  ;;  %v924_v62 = vcombine.low %v1023_v57, %v1027_v60 }
 0x3d7   :  { %v925_v63 = vcombine.low %v1025_v58, %v1029_v61 }
 0x3d8   :  { %v932_v0 = vrot.slane %v924_v62, %v931_v59 }
 0x3d9   :  { %v939_v2 = vrot.slane %v925_v63, %v931_v59 }
 0x3db   :  { %v940_v3 = vcombine.low %v932_v0, %v939_v2 }
 0x3dd   :  { %v947_v4 = vrot.slane %v940_v3, %v931_v59 }
 0x3df   :  { %953 = vst.msk [vmem:[%s1246_s9] sm:$0xf] %vm951_vm3, %v947_v4 }

</bundles_post_ra>
